<compile_context>
chip_gen: v7x
topology: tpu7x:2x2x1
jax: 0.10.0
libtpu: 0.0.40
codegen_flags: <defaults>
</compile_context>

<pallas_src>
import functools
import math

import jax
import jax.numpy as jnp
import numpy as np
from jax.experimental import pallas as pl
from jax.experimental.pallas import tpu as pltpu


def _layernorm(y, gamma, beta, eps=1e-5):
    mu = jnp.mean(y, axis=-1, keepdims=True)
    var = jnp.mean((y - mu) ** 2, axis=-1, keepdims=True)
    return (y - mu) * jax.lax.rsqrt(var + eps) * gamma + beta


def _gelu_exact(x):
    # PyTorch nn.GELU() default (erf-based, not tanh approximation)
    return 0.5 * x * (1.0 + jax.lax.erf(x * (1.0 / math.sqrt(2.0))))


def self_attention_block_kernel(
    x_ref,                         # (R, E)   R = tb * L flattened rows
    wqkv_ref,                      # (3H, E, dh)  stacked per-head q/k/v weights (q pre-scaled)
    bqkv_ref,                      # (3H, 1, dh)  stacked per-head q/k/v biases  (q pre-scaled)
    wo_ref,                        # (H, dh, E)   per-head slices of out-proj weight
    bo_ref,                        # (1, E)
    g0_ref, beta0_ref,             # (1, E) LayerNorm0
    w1_ref, b1_ref,                # (E, M), (1, M)   MLP lin1 (transposed)
    w2_ref, b2_ref,                # (M, E), (1, E)   MLP lin2 (transposed)
    g1_ref, beta1_ref,             # (1, E) LayerNorm1
    out_ref,                       # (R, E)
    *, n_head: int, tb: int, seq_len: int,
):
    R, E = x_ref.shape
    H = n_head
    L = seq_len
    dh = wqkv_ref.shape[-1]
    md = wqkv_ref.dtype            # matmul operand dtype (bf16 or f32)

    x = x_ref[...]                 # (R, E) float32
    x_mm = x.astype(md)

    # ---- Q/K/V projections for all heads in ONE batched matmul ----
    # Broadcast x along the stacked (q,k,v) x head batch axis; contraction is
    # a standard single-batch-dim dot_general (K = E, f32 accumulation).
    xb = jnp.broadcast_to(x_mm[None], (3 * H, R, E))
    qkv = jnp.einsum('hre,hed->hrd', xb, wqkv_ref[...],
                     preferred_element_type=jnp.float32) + bqkv_ref[...]
    # leading-dim slices + leading-dim reshapes only (layout preserved)
    q3 = qkv[:H].reshape(H * tb, L, dh).astype(md)        # (H*tb, L, dh)
    k3 = qkv[H:2 * H].reshape(H * tb, L, dh).astype(md)
    v3 = qkv[2 * H:].reshape(H * tb, L, dh).astype(md)

    # ---- attention scores / softmax / PV, batched over (head, batch) ----
    # scale already folded into the q weights in the wrapper
    s = jnp.einsum('bqd,bkd->bqk', q3, k3,
                   preferred_element_type=jnp.float32)    # (H*tb, L, L)
    s = s - jnp.max(s, axis=-1, keepdims=True)
    p = jnp.exp(s)
    p = p * pl.reciprocal(jnp.sum(p, axis=-1, keepdims=True), approx=True)
    o = jnp.einsum('bqk,bkd->bqd', p.astype(md), v3,
                   preferred_element_type=jnp.float32)    # (H*tb, L, dh)

    # ---- output projection: one batched matmul over heads + leading-axis sum
    # (equivalent to contracting over (h, d); avoids multi-contraction
    #  dot_general / lane-dim relayouts).
    o = o.reshape(H, R, dh).astype(md)
    attn = jnp.einsum('hrd,hde->hre', o, wo_ref[...],
                      preferred_element_type=jnp.float32) # (H, R, E)
    attn_out = jnp.sum(attn, axis=0) + bo_ref[...]        # (R, E)

    # ---- residual + LayerNorm0 ----
    h1 = _layernorm(x + attn_out, g0_ref[...], beta0_ref[...])

    # ---- MLP (lin1 -> GELU -> lin2) over the full row slab ----
    z = jnp.dot(h1.astype(md), w1_ref[...],
                preferred_element_type=jnp.float32) + b1_ref[...]
    z = _gelu_exact(z)
    mlp = jnp.dot(z.astype(md), w2_ref[...],
                  preferred_element_type=jnp.float32) + b2_ref[...]

    # ---- residual + LayerNorm1 ----
    out_ref[...] = _layernorm(h1 + mlp, g1_ref[...], beta1_ref[...])


def _choose_tiling(B, L, target_rows=2048):
    """Pick batches-per-tile tb and grid size.

    Guarantees:
      * rows = tb * L is a multiple of 8 (BlockSpec (8,128) rule),
      * rows per grid step <= ~target_rows (amortizes per-step overhead while
        staying well inside the 16/32 MiB scoped-VMEM defaults),
      * grid >= 2 whenever B >= 2 (feeds both v7x TensorCores / pipelining),
      * works for ANY B (batch is zero-padded up to tb * grid in the wrapper).
    """
    step = 8 // math.gcd(L, 8)              # smallest tb with tb*L % 8 == 0
    tb = max(1, target_rows // L)           # desired batches per slab
    tb = min(tb, max(1, (B + 1) // 2))      # keep >= 2 grid steps when B >= 2
    tb = max(step, ((tb + step - 1) // step) * step)
    grid = max(1, -(-B // tb))              # cdiv
    return tb, grid


def self_attention_block(query, params, n_head, query_pe=None,
                         matmul_dtype=jnp.bfloat16, target_rows=2048):
    """query: (L, B, E) seq-first, matching PyTorch nn.MultiheadAttention.

    matmul_dtype=jnp.bfloat16 (default) is the MXU fast path on v5e/v6e/v7x;
    accumulation, softmax, GELU and LayerNorm stay f32.  Pass jnp.float32 for
    bit-tight validation.
    """
    if query_pe is not None:
        query = query + query_pe                    # glue (elementwise)
    L, B, E = query.shape
    H = n_head
    assert E % H == 0
    dh = E // H
    M = params["w1"].shape[0]                       # mlp_dim
    scale = 1.0 / math.sqrt(dh)

    # flatten (B, L) rows into a single row axis for all dense matmuls
    x = jnp.transpose(query, (1, 0, 2)).astype(jnp.float32).reshape(B * L, E)

    tb, grid = _choose_tiling(B, L, target_rows)
    B_pad = tb * grid
    if B_pad != B:                                  # pad awkward batch sizes
        pad = jnp.zeros(((B_pad - B) * L, E), jnp.float32)
        x = jnp.concatenate([x, pad], axis=0)
    rows = tb * L

    # Split / transpose PyTorch-convention weights in glue so the kernel
    # computes plain  y = x @ W + b, with per-head q/k/v weight slices stacked
    # along ONE leading batch dim (no in-kernel lane slicing) and the softmax
    # scale folded into the q projection.
    wq, wk, wv = jnp.split(params["in_proj_weight"], 3, axis=0)   # (E,E) each
    bq, bk, bv = jnp.split(params["in_proj_bias"], 3, axis=0)     # (E,)  each

    def head_w(w, scl=1.0):
        wt = w.T * scl                                            # (E_in, E_out)
        return wt.reshape(E, H, dh).transpose(1, 0, 2)            # (H, E, dh)

    def head_b(b, scl=1.0):
        return (b * scl).reshape(H, 1, dh)

    w_qkv = jnp.concatenate([head_w(wq, scale), head_w(wk), head_w(wv)],
                            axis=0).astype(matmul_dtype)          # (3H, E, dh)
    b_qkv = jnp.concatenate([head_b(bq, scale), head_b(bk), head_b(bv)],
                            axis=0).astype(jnp.float32)           # (3H, 1, dh)
    wo_h = (params["out_proj_weight"].T.reshape(H, dh, E)
            .astype(matmul_dtype))                                # (H, dh, E)

    args = (
        x,
        w_qkv, b_qkv, wo_h,
        params["out_proj_bias"].reshape(1, E).astype(jnp.float32),
        params["norm0_gamma"].reshape(1, E).astype(jnp.float32),
        params["norm0_beta"].reshape(1, E).astype(jnp.float32),
        params["w1"].T.astype(matmul_dtype),
        params["b1"].reshape(1, M).astype(jnp.float32),
        params["w2"].T.astype(matmul_dtype),
        params["b2"].reshape(1, E).astype(jnp.float32),
        params["norm1_gamma"].reshape(1, E).astype(jnp.float32),
        params["norm1_beta"].reshape(1, E).astype(jnp.float32),
    )

    def full_spec(a):
        n = a.ndim
        return pl.BlockSpec(a.shape, lambda i, _n=n: (0,) * _n)

    in_specs = [pl.BlockSpec((rows, E), lambda i: (i, 0))] + \
               [full_spec(a) for a in args[1:]]

    out = pl.pallas_call(
        functools.partial(self_attention_block_kernel,
                          n_head=H, tb=tb, seq_len=L),
        out_shape=jax.ShapeDtypeStruct((B_pad * L, E), jnp.float32),
        grid=(grid,),
        in_specs=in_specs,
        out_specs=pl.BlockSpec((rows, E), lambda i: (i, 0)),
        compiler_params=pltpu.CompilerParams(
            dimension_semantics=("parallel",)),
    )(*args)

    out = out[:B * L]                                   # drop batch padding
    return jnp.transpose(out.reshape(B, L, E), (1, 0, 2))       # (L, B, E)


# ---------------- pure-JAX reference for verification ----------------
def reference(query, params, n_head, query_pe=None):
    if query_pe is not None:
        query = query + query_pe
    L, B, E = query.shape
    x = jnp.transpose(query, (1, 0, 2))
    wq, wk, wv = jnp.split(params["in_proj_weight"], 3, axis=0)
    bq, bk, bv = jnp.split(params["in_proj_bias"], 3, axis=0)
    dh = E // n_head
    q = (x @ wq.T + bq).reshape(B, L, n_head, dh).transpose(0, 2, 1, 3)
    k = (x @ wk.T + bk).reshape(B, L, n_head, dh).transpose(0, 2, 1, 3)
    v = (x @ wv.T + bv).reshape(B, L, n_head, dh).transpose(0, 2, 1, 3)
    s = jnp.einsum("bhqd,bhkd->bhqk", q, k) / math.sqrt(dh)
    p = jax.nn.softmax(s, axis=-1)
    o = jnp.einsum("bhqk,bhkd->bhqd", p, v).transpose(0, 2, 1, 3).reshape(B, L, E)
    attn_out = o @ params["out_proj_weight"].T + params["out_proj_bias"]

    def ln(y, g, b):
        mu = y.mean(-1, keepdims=True)
        var = ((y - mu) ** 2).mean(-1, keepdims=True)
        return (y - mu) / jnp.sqrt(var + 1e-5) * g + b

    h1 = ln(x + attn_out, params["norm0_gamma"], params["norm0_beta"])
    z = h1 @ params["w1"].T + params["b1"]
    z = 0.5 * z * (1.0 + jax.lax.erf(z / math.sqrt(2.0)))
    mlp = z @ params["w2"].T + params["b2"]
    h2 = ln(h1 + mlp, params["norm1_gamma"], params["norm1_beta"])
    return jnp.transpose(h2, (1, 0, 2))


if __name__ == "__main__":
    E, H, L, B = 32, 4, 8, 2
    M = 2 * E                                       # default mlp_dim

    key = jax.random.PRNGKey(0)
    ks = jax.random.split(key, 8)
    params = {
        "in_proj_weight": 0.02 * jax.random.normal(ks[0], (3 * E, E), jnp.float32),
        "in_proj_bias":   0.01 * jax.random.normal(ks[1], (3 * E,), jnp.float32),
        "out_proj_weight": 0.02 * jax.random.normal(ks[2], (E, E), jnp.float32),
        "out_proj_bias":   jnp.zeros((E,), jnp.float32),
        "norm0_gamma": jnp.ones((E,), jnp.float32),
        "norm0_beta":  jnp.zeros((E,), jnp.float32),
        "w1": 0.02 * jax.random.normal(ks[3], (M, E), jnp.float32),
        "b1": 0.01 * jax.random.normal(ks[4], (M,), jnp.float32),
        "w2": 0.02 * jax.random.normal(ks[5], (E, M), jnp.float32),
        "b2": jnp.zeros((E,), jnp.float32),
        "norm1_gamma": jnp.ones((E,), jnp.float32),
        "norm1_beta":  jnp.zeros((E,), jnp.float32),
    }

    query = jax.random.normal(ks[6], (L, B, E), jnp.float32)      # seq-first
    query_pe = 0.1 * jax.random.normal(ks[7], (L, B, E), jnp.float32)

    # Default fast path: bf16 MXU operands (f32 accumulation / softmax / LN).
    out_bf16 = self_attention_block(query, params, H, query_pe=query_pe)
    out_bf16 = jax.block_until_ready(out_bf16)

    # f32 MXU operands for tight numerical validation.
    out_f32 = self_attention_block(query, params, H, query_pe=query_pe,
                                   matmul_dtype=jnp.float32)
    out_f32 = jax.block_until_ready(out_f32)

    ref = reference(query, params, H, query_pe=query_pe)
    np.testing.assert_allclose(np.asarray(out_f32), np.asarray(ref),
                               rtol=2e-3, atol=2e-3)
    np.testing.assert_allclose(np.asarray(out_bf16), np.asarray(ref),
                               rtol=5e-2, atol=5e-2)
    print("KERNEL_OK")
</pallas_src>

<mosaic_0001>
module attributes {stable_mosaic.version = 11 : i64} {
  func.func @self_attention_block_kernel(%arg0: i32, %arg1: memref<8x32xf32, #tpu.memory_space<vmem>>, %arg2: memref<12x32x8xbf16, #tpu.memory_space<vmem>>, %arg3: memref<12x1x8xf32, #tpu.memory_space<vmem>>, %arg4: memref<4x8x32xbf16, #tpu.memory_space<vmem>>, %arg5: memref<1x32xf32, #tpu.memory_space<vmem>>, %arg6: memref<1x32xf32, #tpu.memory_space<vmem>>, %arg7: memref<1x32xf32, #tpu.memory_space<vmem>>, %arg8: memref<32x64xbf16, #tpu.memory_space<vmem>>, %arg9: memref<1x64xf32, #tpu.memory_space<vmem>>, %arg10: memref<64x32xbf16, #tpu.memory_space<vmem>>, %arg11: memref<1x32xf32, #tpu.memory_space<vmem>>, %arg12: memref<1x32xf32, #tpu.memory_space<vmem>>, %arg13: memref<1x32xf32, #tpu.memory_space<vmem>>, %arg14: memref<8x32xf32, #tpu.memory_space<vmem>>) attributes {dimension_semantics = [#tpu.dimension_semantics<parallel>], iteration_bounds = array<i64: 2>, scalar_prefetch = 0 : i64, scratch_operands = 0 : i64, tpu.core_type = #tpu.core_type<tc>, window_params = [{transform_indices = @transform_0, window_bounds = array<i64: 8, 32>}, {pipeline_mode = #tpu.pipeline_mode<synchronous>, transform_indices = @transform_1, window_bounds = array<i64: 12, 32, 8>}, {pipeline_mode = #tpu.pipeline_mode<synchronous>, transform_indices = @transform_2, window_bounds = array<i64: 12, 1, 8>}, {pipeline_mode = #tpu.pipeline_mode<synchronous>, transform_indices = @transform_3, window_bounds = array<i64: 4, 8, 32>}, {pipeline_mode = #tpu.pipeline_mode<synchronous>, transform_indices = @transform_4, window_bounds = array<i64: 1, 32>}, {pipeline_mode = #tpu.pipeline_mode<synchronous>, transform_indices = @transform_5, window_bounds = array<i64: 1, 32>}, {pipeline_mode = #tpu.pipeline_mode<synchronous>, transform_indices = @transform_6, window_bounds = array<i64: 1, 32>}, {pipeline_mode = #tpu.pipeline_mode<synchronous>, transform_indices = @transform_7, window_bounds = array<i64: 32, 64>}, {pipeline_mode = #tpu.pipeline_mode<synchronous>, transform_indices = @transform_8, window_bounds = array<i64: 1, 64>}, {pipeline_mode = #tpu.pipeline_mode<synchronous>, transform_indices = @transform_9, window_bounds = array<i64: 64, 32>}, {pipeline_mode = #tpu.pipeline_mode<synchronous>, transform_indices = @transform_10, window_bounds = array<i64: 1, 32>}, {pipeline_mode = #tpu.pipeline_mode<synchronous>, transform_indices = @transform_11, window_bounds = array<i64: 1, 32>}, {pipeline_mode = #tpu.pipeline_mode<synchronous>, transform_indices = @transform_12, window_bounds = array<i64: 1, 32>}, {transform_indices = @transform_13, window_bounds = array<i64: 8, 32>}]} {
    %c0 = arith.constant 0 : index
    %c0_0 = arith.constant 0 : index
    %0 = vector.load %arg1[%c0, %c0_0] : memref<8x32xf32, #tpu.memory_space<vmem>>, vector<8x32xf32>
    %1 = arith.truncf %0 : vector<8x32xf32> to vector<8x32xbf16>
    %2 = vector.shape_cast %1 : vector<8x32xbf16> to vector<1x8x32xbf16>
    %3 = vector.shape_cast %2 : vector<1x8x32xbf16> to vector<1x8x32xbf16>
    %4 = vector.broadcast %3 : vector<1x8x32xbf16> to vector<12x8x32xbf16>
    %c0_1 = arith.constant 0 : index
    %c0_2 = arith.constant 0 : index
    %c0_3 = arith.constant 0 : index
    %5 = vector.load %arg2[%c0_1, %c0_2, %c0_3] : memref<12x32x8xbf16, #tpu.memory_space<vmem>>, vector<12x32x8xbf16>
    "tpu.trace_start"() <{level = 10 : i32, message = "hre,hed->hrd"}> : () -> ()
    %cst = arith.constant dense<0.000000e+00> : vector<12x8x8xf32>
    %6 = tpu.matmul %4, %5, %cst {dimension_numbers = #tpu.dot_dimension_numbers<[2], [1], [1], [2], [0, 0, 0, 1, 1, 2], [0], [0]>} : vector<12x8x32xbf16>, vector<12x32x8xbf16>, vector<12x8x8xf32> -> vector<12x8x8xf32>
    "tpu.trace_stop"() : () -> ()
    %c0_4 = arith.constant 0 : index
    %c0_5 = arith.constant 0 : index
    %c0_6 = arith.constant 0 : index
    %7 = vector.load %arg3[%c0_4, %c0_5, %c0_6] : memref<12x1x8xf32, #tpu.memory_space<vmem>>, vector<12x1x8xf32>
    %8 = vector.broadcast %7 : vector<12x1x8xf32> to vector<12x8x8xf32>
    %9 = arith.addf %6, %8 : vector<12x8x8xf32>
    %10 = vector.extract_strided_slice %9 {offsets = [0, 0, 0], sizes = [4, 8, 8], strides = [1, 1, 1]} : vector<12x8x8xf32> to vector<4x8x8xf32>
    %11 = arith.truncf %10 : vector<4x8x8xf32> to vector<4x8x8xbf16>
    %12 = vector.extract_strided_slice %9 {offsets = [4, 0, 0], sizes = [4, 8, 8], strides = [1, 1, 1]} : vector<12x8x8xf32> to vector<4x8x8xf32>
    %13 = arith.truncf %12 : vector<4x8x8xf32> to vector<4x8x8xbf16>
    %14 = vector.extract_strided_slice %9 {offsets = [8, 0, 0], sizes = [4, 8, 8], strides = [1, 1, 1]} : vector<12x8x8xf32> to vector<4x8x8xf32>
    %15 = arith.truncf %14 : vector<4x8x8xf32> to vector<4x8x8xbf16>
    "tpu.trace_start"() <{level = 10 : i32, message = "bqd,bkd->bqk"}> : () -> ()
    %cst_7 = arith.constant dense<0.000000e+00> : vector<4x8x8xf32>
    %16 = tpu.matmul %11, %13, %cst_7 {dimension_numbers = #tpu.dot_dimension_numbers<[2], [2], [1], [1], [0, 0, 0, 1, 1, 1], [0], [0]>} : vector<4x8x8xbf16>, vector<4x8x8xbf16>, vector<4x8x8xf32> -> vector<4x8x8xf32>
    "tpu.trace_stop"() : () -> ()
    %cst_8 = arith.constant dense<0xFF800000> : vector<4x8xf32>
    %17 = vector.multi_reduction <maximumf>, %16, %cst_8 [2] : vector<4x8x8xf32> to vector<4x8xf32>
    %18 = vector.shape_cast %17 : vector<4x8xf32> to vector<4x8x1xf32>
    %19 = vector.broadcast %18 : vector<4x8x1xf32> to vector<4x8x8xf32>
    %20 = arith.subf %16, %19 : vector<4x8x8xf32>
    %21 = math.exp %20 : vector<4x8x8xf32>
    %cst_9 = arith.constant dense<0.000000e+00> : vector<4x8xf32>
    %22 = vector.multi_reduction <add>, %21, %cst_9 [2] : vector<4x8x8xf32> to vector<4x8xf32>
    %23 = vector.shape_cast %22 : vector<4x8xf32> to vector<4x8x1xf32>
    %24 = tpu.reciprocal %23 {approx = true} : vector<4x8x1xf32> -> vector<4x8x1xf32>
    %25 = vector.broadcast %24 : vector<4x8x1xf32> to vector<4x8x8xf32>
    %26 = arith.mulf %21, %25 : vector<4x8x8xf32>
    %27 = arith.truncf %26 : vector<4x8x8xf32> to vector<4x8x8xbf16>
    "tpu.trace_start"() <{level = 10 : i32, message = "bqk,bkd->bqd"}> : () -> ()
    %cst_10 = arith.constant dense<0.000000e+00> : vector<4x8x8xf32>
    %28 = tpu.matmul %27, %15, %cst_10 {dimension_numbers = #tpu.dot_dimension_numbers<[2], [1], [1], [2], [0, 0, 0, 1, 1, 2], [0], [0]>} : vector<4x8x8xbf16>, vector<4x8x8xbf16>, vector<4x8x8xf32> -> vector<4x8x8xf32>
    "tpu.trace_stop"() : () -> ()
    %29 = arith.truncf %28 : vector<4x8x8xf32> to vector<4x8x8xbf16>
    %c0_11 = arith.constant 0 : index
    %c0_12 = arith.constant 0 : index
    %c0_13 = arith.constant 0 : index
    %30 = vector.load %arg4[%c0_11, %c0_12, %c0_13] : memref<4x8x32xbf16, #tpu.memory_space<vmem>>, vector<4x8x32xbf16>
    "tpu.trace_start"() <{level = 10 : i32, message = "hrd,hde->hre"}> : () -> ()
    %cst_14 = arith.constant dense<0.000000e+00> : vector<4x8x32xf32>
    %31 = tpu.matmul %29, %30, %cst_14 {dimension_numbers = #tpu.dot_dimension_numbers<[2], [1], [1], [2], [0, 0, 0, 1, 1, 2], [0], [0]>} : vector<4x8x8xbf16>, vector<4x8x32xbf16>, vector<4x8x32xf32> -> vector<4x8x32xf32>
    "tpu.trace_stop"() : () -> ()
    %cst_15 = arith.constant dense<0.000000e+00> : vector<8x32xf32>
    %32 = vector.multi_reduction <add>, %31, %cst_15 [0] : vector<4x8x32xf32> to vector<8x32xf32>
    %c0_16 = arith.constant 0 : index
    %c0_17 = arith.constant 0 : index
    %33 = vector.load %arg5[%c0_16, %c0_17] : memref<1x32xf32, #tpu.memory_space<vmem>>, vector<1x32xf32>
    %34 = vector.broadcast %33 : vector<1x32xf32> to vector<8x32xf32>
    %35 = arith.addf %32, %34 : vector<8x32xf32>
    %36 = arith.addf %0, %35 : vector<8x32xf32>
    %c0_18 = arith.constant 0 : index
    %c0_19 = arith.constant 0 : index
    %37 = vector.load %arg6[%c0_18, %c0_19] : memref<1x32xf32, #tpu.memory_space<vmem>>, vector<1x32xf32>
    %c0_20 = arith.constant 0 : index
    %c0_21 = arith.constant 0 : index
    %38 = vector.load %arg7[%c0_20, %c0_21] : memref<1x32xf32, #tpu.memory_space<vmem>>, vector<1x32xf32>
    %cst_22 = arith.constant dense<0.000000e+00> : vector<8xf32>
    %39 = vector.multi_reduction <add>, %36, %cst_22 [1] : vector<8x32xf32> to vector<8xf32>
    %40 = vector.shape_cast %39 : vector<8xf32> to vector<8x1xf32>
    %cst_23 = arith.constant 3.200000e+01 : f32
    %41 = vector.broadcast %cst_23 : f32 to vector<8x1xf32>
    %42 = arith.divf %40, %41 : vector<8x1xf32>
    %43 = vector.broadcast %42 : vector<8x1xf32> to vector<8x32xf32>
    %44 = arith.subf %36, %43 : vector<8x32xf32>
    %45 = arith.mulf %44, %44 : vector<8x32xf32>
    %cst_24 = arith.constant dense<0.000000e+00> : vector<8xf32>
    %46 = vector.multi_reduction <add>, %45, %cst_24 [1] : vector<8x32xf32> to vector<8xf32>
    %47 = vector.shape_cast %46 : vector<8xf32> to vector<8x1xf32>
    %cst_25 = arith.constant 3.200000e+01 : f32
    %48 = vector.broadcast %cst_25 : f32 to vector<8x1xf32>
    %49 = arith.divf %47, %48 : vector<8x1xf32>
    %50 = vector.broadcast %42 : vector<8x1xf32> to vector<8x32xf32>
    %51 = arith.subf %36, %50 : vector<8x32xf32>
    %cst_26 = arith.constant 9.99999974E-6 : f32
    %52 = vector.broadcast %cst_26 : f32 to vector<8x1xf32>
    %53 = arith.addf %49, %52 : vector<8x1xf32>
    %54 = math.rsqrt %53 : vector<8x1xf32>
    %55 = vector.broadcast %54 : vector<8x1xf32> to vector<8x32xf32>
    %56 = arith.mulf %51, %55 : vector<8x32xf32>
    %57 = vector.broadcast %37 : vector<1x32xf32> to vector<8x32xf32>
    %58 = arith.mulf %56, %57 : vector<8x32xf32>
    %59 = vector.broadcast %38 : vector<1x32xf32> to vector<8x32xf32>
    %60 = arith.addf %58, %59 : vector<8x32xf32>
    %61 = arith.truncf %60 : vector<8x32xf32> to vector<8x32xbf16>
    %c0_27 = arith.constant 0 : index
    %c0_28 = arith.constant 0 : index
    %62 = vector.load %arg8[%c0_27, %c0_28] : memref<32x64xbf16, #tpu.memory_space<vmem>>, vector<32x64xbf16>
    %cst_29 = arith.constant dense<0.000000e+00> : vector<8x64xf32>
    %63 = tpu.matmul %61, %62, %cst_29 {dimension_numbers = #tpu.dot_dimension_numbers<[1], [0], [0], [1], [0, 0, 1, 1], [], []>} : vector<8x32xbf16>, vector<32x64xbf16>, vector<8x64xf32> -> vector<8x64xf32>
    %c0_30 = arith.constant 0 : index
    %c0_31 = arith.constant 0 : index
    %64 = vector.load %arg9[%c0_30, %c0_31] : memref<1x64xf32, #tpu.memory_space<vmem>>, vector<1x64xf32>
    %65 = vector.broadcast %64 : vector<1x64xf32> to vector<8x64xf32>
    %66 = arith.addf %63, %65 : vector<8x64xf32>
    %cst_32 = arith.constant 5.000000e-01 : f32
    %67 = vector.broadcast %cst_32 : f32 to vector<8x64xf32>
    %68 = arith.mulf %67, %66 : vector<8x64xf32>
    %cst_33 = arith.constant 0.707106769 : f32
    %69 = vector.broadcast %cst_33 : f32 to vector<8x64xf32>
    %70 = arith.mulf %66, %69 : vector<8x64xf32>
    %71 = math.erf %70 : vector<8x64xf32>
    %cst_34 = arith.constant 1.000000e+00 : f32
    %72 = vector.broadcast %cst_34 : f32 to vector<8x64xf32>
    %73 = arith.addf %72, %71 : vector<8x64xf32>
    %74 = arith.mulf %68, %73 : vector<8x64xf32>
    %75 = arith.truncf %74 : vector<8x64xf32> to vector<8x64xbf16>
    %c0_35 = arith.constant 0 : index
    %c0_36 = arith.constant 0 : index
    %76 = vector.load %arg10[%c0_35, %c0_36] : memref<64x32xbf16, #tpu.memory_space<vmem>>, vector<64x32xbf16>
    %cst_37 = arith.constant dense<0.000000e+00> : vector<8x32xf32>
    %77 = tpu.matmul %75, %76, %cst_37 {dimension_numbers = #tpu.dot_dimension_numbers<[1], [0], [0], [1], [0, 0, 1, 1], [], []>} : vector<8x64xbf16>, vector<64x32xbf16>, vector<8x32xf32> -> vector<8x32xf32>
    %c0_38 = arith.constant 0 : index
    %c0_39 = arith.constant 0 : index
    %78 = vector.load %arg11[%c0_38, %c0_39] : memref<1x32xf32, #tpu.memory_space<vmem>>, vector<1x32xf32>
    %79 = vector.broadcast %78 : vector<1x32xf32> to vector<8x32xf32>
    %80 = arith.addf %77, %79 : vector<8x32xf32>
    %81 = arith.addf %60, %80 : vector<8x32xf32>
    %c0_40 = arith.constant 0 : index
    %c0_41 = arith.constant 0 : index
    %82 = vector.load %arg12[%c0_40, %c0_41] : memref<1x32xf32, #tpu.memory_space<vmem>>, vector<1x32xf32>
    %c0_42 = arith.constant 0 : index
    %c0_43 = arith.constant 0 : index
    %83 = vector.load %arg13[%c0_42, %c0_43] : memref<1x32xf32, #tpu.memory_space<vmem>>, vector<1x32xf32>
    %cst_44 = arith.constant dense<0.000000e+00> : vector<8xf32>
    %84 = vector.multi_reduction <add>, %81, %cst_44 [1] : vector<8x32xf32> to vector<8xf32>
    %85 = vector.shape_cast %84 : vector<8xf32> to vector<8x1xf32>
    %cst_45 = arith.constant 3.200000e+01 : f32
    %86 = vector.broadcast %cst_45 : f32 to vector<8x1xf32>
    %87 = arith.divf %85, %86 : vector<8x1xf32>
    %88 = vector.broadcast %87 : vector<8x1xf32> to vector<8x32xf32>
    %89 = arith.subf %81, %88 : vector<8x32xf32>
    %90 = arith.mulf %89, %89 : vector<8x32xf32>
    %cst_46 = arith.constant dense<0.000000e+00> : vector<8xf32>
    %91 = vector.multi_reduction <add>, %90, %cst_46 [1] : vector<8x32xf32> to vector<8xf32>
    %92 = vector.shape_cast %91 : vector<8xf32> to vector<8x1xf32>
    %cst_47 = arith.constant 3.200000e+01 : f32
    %93 = vector.broadcast %cst_47 : f32 to vector<8x1xf32>
    %94 = arith.divf %92, %93 : vector<8x1xf32>
    %95 = vector.broadcast %87 : vector<8x1xf32> to vector<8x32xf32>
    %96 = arith.subf %81, %95 : vector<8x32xf32>
    %cst_48 = arith.constant 9.99999974E-6 : f32
    %97 = vector.broadcast %cst_48 : f32 to vector<8x1xf32>
    %98 = arith.addf %94, %97 : vector<8x1xf32>
    %99 = math.rsqrt %98 : vector<8x1xf32>
    %100 = vector.broadcast %99 : vector<8x1xf32> to vector<8x32xf32>
    %101 = arith.mulf %96, %100 : vector<8x32xf32>
    %102 = vector.broadcast %82 : vector<1x32xf32> to vector<8x32xf32>
    %103 = arith.mulf %101, %102 : vector<8x32xf32>
    %104 = vector.broadcast %83 : vector<1x32xf32> to vector<8x32xf32>
    %105 = arith.addf %103, %104 : vector<8x32xf32>
    %c0_49 = arith.constant 0 : index
    %c0_50 = arith.constant 0 : index
    %106 = vector.load %arg14[%c0_49, %c0_50] : memref<8x32xf32, #tpu.memory_space<vmem>>, vector<8x32xf32>
    tpu.vector_store %arg14[%c0_49, %c0_50], %105 {strides = array<i32>} : memref<8x32xf32, #tpu.memory_space<vmem>>, vector<8x32xf32>,
    return
  }
  func.func @transform_0(%arg0: i32) -> (i32, i32) {
    %c0_i32 = arith.constant 0 : i32
    %c0_i32_0 = arith.constant 0 : i32
    return %arg0, %c0_i32 : i32, i32
  }
  func.func @transform_1(%arg0: i32) -> (i32, i32, i32) {
    %c0_i32 = arith.constant 0 : i32
    %c0_i32_0 = arith.constant 0 : i32
    %c0_i32_1 = arith.constant 0 : i32
    %c0_i32_2 = arith.constant 0 : i32
    return %c0_i32, %c0_i32_0, %c0_i32_1 : i32, i32, i32
  }
  func.func @transform_2(%arg0: i32) -> (i32, i32, i32) {
    %c0_i32 = arith.constant 0 : i32
    %c0_i32_0 = arith.constant 0 : i32
    %c0_i32_1 = arith.constant 0 : i32
    %c0_i32_2 = arith.constant 0 : i32
    return %c0_i32, %c0_i32_0, %c0_i32_1 : i32, i32, i32
  }
  func.func @transform_3(%arg0: i32) -> (i32, i32, i32) {
    %c0_i32 = arith.constant 0 : i32
    %c0_i32_0 = arith.constant 0 : i32
    %c0_i32_1 = arith.constant 0 : i32
    %c0_i32_2 = arith.constant 0 : i32
    return %c0_i32, %c0_i32_0, %c0_i32_1 : i32, i32, i32
  }
  func.func @transform_4(%arg0: i32) -> (i32, i32) {
    %c0_i32 = arith.constant 0 : i32
    %c0_i32_0 = arith.constant 0 : i32
    %c0_i32_1 = arith.constant 0 : i32
    return %c0_i32, %c0_i32_0 : i32, i32
  }
  func.func @transform_5(%arg0: i32) -> (i32, i32) {
    %c0_i32 = arith.constant 0 : i32
    %c0_i32_0 = arith.constant 0 : i32
    %c0_i32_1 = arith.constant 0 : i32
    return %c0_i32, %c0_i32_0 : i32, i32
  }
  func.func @transform_6(%arg0: i32) -> (i32, i32) {
    %c0_i32 = arith.constant 0 : i32
    %c0_i32_0 = arith.constant 0 : i32
    %c0_i32_1 = arith.constant 0 : i32
    return %c0_i32, %c0_i32_0 : i32, i32
  }
  func.func @transform_7(%arg0: i32) -> (i32, i32) {
    %c0_i32 = arith.constant 0 : i32
    %c0_i32_0 = arith.constant 0 : i32
    %c0_i32_1 = arith.constant 0 : i32
    return %c0_i32, %c0_i32_0 : i32, i32
  }
  func.func @transform_8(%arg0: i32) -> (i32, i32) {
    %c0_i32 = arith.constant 0 : i32
    %c0_i32_0 = arith.constant 0 : i32
    %c0_i32_1 = arith.constant 0 : i32
    return %c0_i32, %c0_i32_0 : i32, i32
  }
  func.func @transform_9(%arg0: i32) -> (i32, i32) {
    %c0_i32 = arith.constant 0 : i32
    %c0_i32_0 = arith.constant 0 : i32
    %c0_i32_1 = arith.constant 0 : i32
    return %c0_i32, %c0_i32_0 : i32, i32
  }
  func.func @transform_10(%arg0: i32) -> (i32, i32) {
    %c0_i32 = arith.constant 0 : i32
    %c0_i32_0 = arith.constant 0 : i32
    %c0_i32_1 = arith.constant 0 : i32
    return %c0_i32, %c0_i32_0 : i32, i32
  }
  func.func @transform_11(%arg0: i32) -> (i32, i32) {
    %c0_i32 = arith.constant 0 : i32
    %c0_i32_0 = arith.constant 0 : i32
    %c0_i32_1 = arith.constant 0 : i32
    return %c0_i32, %c0_i32_0 : i32, i32
  }
  func.func @transform_12(%arg0: i32) -> (i32, i32) {
    %c0_i32 = arith.constant 0 : i32
    %c0_i32_0 = arith.constant 0 : i32
    %c0_i32_1 = arith.constant 0 : i32
    return %c0_i32, %c0_i32_0 : i32, i32
  }
  func.func @transform_13(%arg0: i32) -> (i32, i32) {
    %c0_i32 = arith.constant 0 : i32
    %c0_i32_0 = arith.constant 0 : i32
    return %arg0, %c0_i32 : i32, i32
  }
}

</mosaic_0001>

<bundles_post_ra>
// kernel: tpu_custom_call.1
= control target key start
LH: loop header
LB: loop body
LE: loop exit
PB: predicated region body
PF: predicated region fallthrough
CT: control target
= control target key end

     0   :  { %s3130_s0 = inlined_call_operand.vmem [shape: f32[16,32], index: 0, kind: input, shape index: {}]   ;;  %s3131_s1 = inlined_call_operand.vmem [shape: bf16[12,32,8], index: 1, kind: input, shape index: {}]   ;;  %s3132_s2 = inlined_call_operand.vmem [shape: f32[12,1,8], index: 2, kind: input, shape index: {}]   ;;  %s3133_s3 = inlined_call_operand.vmem [shape: bf16[4,8,32], index: 3, kind: input, shape index: {}]   ;;  %s3134_s4 = inlined_call_operand.vmem [shape: f32[1,32], index: 4, kind: input, shape index: {}]   ;;  %s3135_s5 = inlined_call_operand.vmem [shape: f32[1,32], index: 5, kind: input, shape index: {}]   ;;  %s3136_s6 = inlined_call_operand.vmem [shape: f32[1,32], index: 6, kind: input, shape index: {}]   ;;  %s3137_s7 = inlined_call_operand.vmem [shape: bf16[32,64], index: 7, kind: input, shape index: {}]   ;;  %s3138_s8 = inlined_call_operand.vmem [shape: f32[1,64], index: 8, kind: input, shape index: {}]   ;;  %s3139_s9 = inlined_call_operand.vmem [shape: bf16[64,32], index: 9, kind: input, shape index: {}]   ;;  %s3140_s10 = inlined_call_operand.vmem [shape: f32[1,32], index: 10, kind: input, shape index: {}]   ;;  %s3141_s11 = inlined_call_operand.vmem [shape: f32[1,32], index: 11, kind: input, shape index: {}]   ;;  %s3142_s12 = inlined_call_operand.vmem [shape: f32[1,32], index: 12, kind: input, shape index: {}]   ;;  %s3143_s13 = inlined_call_operand.hbm [shape: f32[16,32], index: 13, kind: output, shape index: {}]  }
   0x1   :  { %3144 = sst [smem:[#allocation6_spill]] %s3130_s0 }
   0x2   :  { %3145 = sst [smem:[#allocation7_spill]] %s3131_s1 }
   0x3   :  { %3146 = sst [smem:[#allocation8_spill]] %s3132_s2 }
   0x4   :  { %18 = vsyncpa [#allocation3], 0 }
   0x5   :  { %20 = vsyncpa [#allocation3 + $0x1], 0  ;;  %s2698_s25 = smov 0   ;;  %s2700_s26 = smov 0  }
   0x6   :  { %s2702_s27 = smov 0   ;;  %s2704_s28 = smov 0  }
   0x7 LB: > { %s2719_s29 = sadd.s32 4294967295, %s2623_s28   ;;  %s2127_s30 = sadd.s32 4294967294, %s2623_s28   ;;  %s2623_s28 = sphi %s2704_s28, %s3157_s28   ;;  %s2619_s27 = sphi %s2702_s27, %s3156_s27   ;;  %s2615_s26 = sphi %s2700_s26, %s3155_s26   ;;  %s2611_s25 = sphi %s2698_s25, %s3154_s25  }
   0x8   : > { %s2723_s14 = sadd.s32 1, %s2623_s28   ;;  %s311_s15 = sadd.s32 1, %s2619_s27 }
   0x9   : > { %s308_s16 = ssub.s32 %s2623_s28, %s2723_s14  ;;  %p321_p0 = scmp.ne.s32.totalorder %s2619_s27, %s2615_s26 }
   0xa   : > { %p309_p1 = scmp.eq.s32.totalorder %s308_s16, 0  ;;  %p322_p2 = scmp.eq.s32.totalorder %s2719_s29, 1 }
   0xb   : > { %p327_p3 = scmp.ne.s32.totalorder %s2615_s26, %s2611_s25  ;;  %p328_p4 = scmp.eq.s32.totalorder %s2127_s30, 1 }
   0xc   : > { %s2734_s17 = scalar_select %p309_p1, %s2619_s27, %s311_s15  }
   0xd   : > { %p2736_p5 = por %p322_p2, %p321_p0  ;;  %p2740_p6 = por %p328_p4, %p327_p3 }
   0xe   : > { %3147 = sst [smem:[#allocation5_spill]] %s2734_s17  ;;  %p2130_p7 = scmp.ge.s32.totalorder %s2623_s28, 1 }
   0xf   : > { %p389_p8 = scmp.lt.s32.totalorder %s2623_s28, 3 }
  0x11   : > { %p390_p9 = pnand %p2130_p7, %p389_p8 }
  0x12   : > { %s3150_s1 = sld [smem:[#allocation7_spill]] (!%p390_p9)  ;;  %v2625_v1 = vmov (!%p390_p9), 0.0   ;;  %vm2626_vm0 = vmmov (!%p390_p9), 0   ;;  %p432_p10 = scmp.lt.s32.totalorder (!%p390_p9), %s2719_s29, 1  ;;  %vm583_vm1 = vcmask (!%p390_p9), 261120   ;;  %vm1211_vm2 = vcmask (!%p390_p9), 64512  }
  0x13   : > { %393 = sbr.rel (%p390_p9) target bundleno = 2337 (0x921), region = 72  ;;  %2280 = vmatprep.subr.bf16.mxu0 (!%p390_p9), %v2625_v1  ;;  %2288 = vmatprep.subr.bf16.mxu1 (!%p390_p9), %v2625_v1  ;;  %s3151_s0 = sld [smem:[#allocation6_spill]] (!%p390_p9)  ;;  %vm1447_vm3 = vcmask (!%p390_p9), 1043456   ;;  %vm1979_vm4 = vcmask (!%p390_p9), 523264  }
  0x14   : > { %2284 = vmatprep.mubr.msk.bf16.mxu0 (!%p390_p9), %vm2626_vm0, %v2625_v1  ;;  %2292 = vmatprep.mubr.msk.bf16.mxu1 (!%p390_p9), %vm2626_vm0, %v2625_v1  ;;  %s3152_s2 = sld [smem:[#allocation8_spill]] (!%p390_p9)  ;;  %s2209_s30 = sshll.u32 (!%p390_p9), %s2719_s29, 7 }
  0x18   : > { %v2509_v0 = vld [vmem:[%s3150_s1] sm:$0xff] (!%p390_p9)   ;;  %v2510_v2 = vld [vmem:[%s3150_s1 + $0x10] sm:$0xff] (!%p390_p9)   ;;  %v2511_v3 = vld [vmem:[%s3150_s1 + $0x8] sm:$0xff] (!%p390_p9)  }
  0x19   : > { %2281 = vmatpush3.bf16.msra.mxu0 (!%p390_p9), %v2509_v0  ;;  %2289 = vmatpush3.bf16.msra.mxu1 (!%p390_p9), %v2510_v2  ;;  %v2512_v4 = vld [vmem:[%s3150_s1 + $0x18] sm:$0xff] (!%p390_p9)   ;;  %v2513_v5 = vld [vmem:[%s3150_s1 + $0x20] sm:$0xff] (!%p390_p9)   ;;  %v2514_v6 = vld [vmem:[%s3150_s1 + $0x30] sm:$0xff] (!%p390_p9)  }
  0x1a   : > { %2282 = vmatprep.subr.bf16.mxu0 %v2625_v1  ;;  %2290 = vmatprep.subr.bf16.mxu1 %v2625_v1  ;;  %s433_s20 = scalar_select %p432_p10, %s2719_s29, 1  ;;  %v2515_v9 = vld [vmem:[%s3150_s1 + $0x28] sm:$0xff]   ;;  %v2516_v10 = vld [vmem:[%s3150_s1 + $0x38] sm:$0xff]   ;;  %v2517_v11 = vld [vmem:[%s3150_s1 + $0x40] sm:$0xff]  }
  0x1b   : > { %v2518_v12 = vld [vmem:[%s3150_s1 + $0x50] sm:$0xff]   ;;  %v2519_v13 = vld [vmem:[%s3150_s1 + $0x48] sm:$0xff]   ;;  %v2520_v14 = vld [vmem:[%s3150_s1 + $0x58] sm:$0xff]   ;;  %s2627_s29 = smov [#allocation2]  }
  0x1c   : > { %s2132_s21 = sshll.u32 %s433_s20, 3  ;;  %v2521_v15 = vld [vmem:[%s3150_s1 + $0x60] sm:$0xff]   ;;  %v2522_v16 = vld [vmem:[%s3150_s1 + $0x70] sm:$0xff]   ;;  %v2523_v17 = vld [vmem:[%s3150_s1 + $0x68] sm:$0xff]   ;;  %s429_s20 = sand.u32 1, %s2615_s26  }
  0x1d   : > { %2283 = vmatpush3.bf16.msra.mxu0 %v2511_v3  ;;  %2291 = vmatpush3.bf16.msra.mxu1 %v2512_v4  ;;  %s435_s17 = scalar_lea.vmem %s3151_s0, %s2132_s21  ;;  %v2524_v18 = vld [vmem:[%s3150_s1 + $0x78] sm:$0xff]   ;;  %v2525_v19 = vld [vmem:[%s3150_s1 + $0x80] sm:$0xff]   ;;  %v2526_v20 = vld [vmem:[%s3150_s1 + $0x90] sm:$0xff]   ;;  %s2131_s21 = sshll.u32 %s429_s20, 3 }
  0x1e   : > { %2296 = vmatprep.subr.bf16.mxu0 %v2625_v1  ;;  %v2778_v7 = vld [vmem:[%s435_s17] sm:$0xff]  ;;  %2304 = vmatprep.subr.bf16.mxu1 %v2625_v1  ;;  %v2527_v21 = vld [vmem:[%s3150_s1 + $0x88] sm:$0xff]   ;;  %v2528_v22 = vld [vmem:[%s3150_s1 + $0x98] sm:$0xff]   ;;  %s431_s15 = scalar_lea.vmem [#allocation2], %s2131_s21  ;;  %s2055_s17 = scalar_lea.sflag [#allocation3], %s429_s20 }
  0x1f   : > { %v2783_v8 = vpack.c.bf16 %v2778_v7, %v2778_v7  ;;  %v2529_v23 = vld [vmem:[%s3150_s1 + $0xa0] sm:$0xff]   ;;  %v2530_v24 = vld [vmem:[%s3150_s1 + $0xb0] sm:$0xff]   ;;  %v2531_v25 = vld [vmem:[%s3150_s1 + $0xa8] sm:$0xff]   ;;  %s2068_s16 = sshll.u32 %s431_s15, 4  ;;  %s2565_s21 = sshll.u32 %s2627_s29, 4  ;;  %s3089_s16 = int_to_ptr.vmem [resolvable:$true] %s2068_s16  ;;  %s2566_s21 = int_to_ptr.vmem [resolvable:$false] %s2565_s21 }
  0x20   : > { %v2532_v26 = vld [vmem:[%s3150_s1 + $0xb8] sm:$0xff]   ;;  %v2137_v43 = vld [vmem:[%s3152_s2 + $0x4] ss:$0 sm:$0xff]  ;;  %v2138_v44 = vld [vmem:[%s3152_s2 + $0x5] ss:$0 sm:$0xff]  ;;  %s2561_s22 = scalar_lea.vmem %s3089_s16, 128  ;;  %p2568_p0 = scmp.lt.s32.totalorder %s3089_s16, %s2566_s21 }
  0x21   : > { %2285 = vmatmul.mubr.msk.bf16.vlgmr.msra.gmra.mrb[0].mxu0 %vm583_vm1, %v2783_v8  ;;  %2293 = vmatmul.mubr.msk.bf16.vlgmr.msra.gmra.mrb[0].mxu1 %vm583_vm1, %v2783_v8  ;;  %v2133_v57 = vld [vmem:[%s3152_s2] ss:$0 sm:$0xff]  ;;  %v2134_v58 = vld [vmem:[%s3152_s2 + $0x1] ss:$0 sm:$0xff]  ;;  %v2139_v61 = vld [vmem:[%s3152_s2 + $0x6] ss:$0 sm:$0xff]  ;;  %p2562_p11 = scmp.ne.s32.totalorder %s3089_s16, %s2561_s22 }
  0x22   : > { %2297 = vmatpush3.bf16.msra.mxu0 %v2513_v5  ;;  %2305 = vmatpush3.bf16.msra.mxu1 %v2514_v6  ;;  %v2140_v62 = vld [vmem:[%s3152_s2 + $0x7] ss:$0 sm:$0xff]  ;;  %s2567_s23 = scalar_lea.vmem %s2566_s21, 256 }
  0x23   : > { %2298 = vmatprep.subr.bf16.mxu0 %v2625_v1  ;;  %2306 = vmatprep.subr.bf16.mxu1 %v2625_v1  ;;  %p2563_p12 = pnand %p2562_p11, %p2736_p5  ;;  %p2569_p1 = scmp.lt.s32.totalorder %s2567_s23, %s2561_s22 }
  0x24   : > { %2300 = vmatprep.mubr.msk.bf16.mxu0 %vm2626_vm0, %v2625_v1  ;;  %2308 = vmatprep.mubr.msk.bf16.mxu1 %vm2626_vm0, %v2625_v1 }
  0x25   : > { %p2564_p13 = pneg %p2563_p12  ;;  %p2570_p2 = por %p2569_p1, %p2568_p0 }
  0x26   : > { %2299 = vmatpush3.bf16.msra.mxu0 %v2515_v9  ;;  %2307 = vmatpush3.bf16.msra.mxu1 %v2516_v10 }
  0x27   : > { %2312 = vmatprep.subr.bf16.mxu0 %v2625_v1  ;;  %2320 = vmatprep.subr.bf16.mxu1 %v2625_v1  ;;  %p2571_p3 = pnand %p2570_p2, %p2564_p13 }
  0x29   : > { %2301 = vmatmul.mubr.msk.bf16.vlgmr.msra.gmra.mrb[4].mxu0 %vm583_vm1, %v2783_v8  ;;  %2309 = vmatmul.mubr.msk.bf16.vlgmr.msra.gmra.mrb[4].mxu1 %vm583_vm1, %v2783_v8 }
  0x2a   : > { %2313 = vmatpush3.bf16.msra.mxu0 %v2517_v11  ;;  %2321 = vmatpush3.bf16.msra.mxu1 %v2518_v12 }
  0x2b   : > { %2314 = vmatprep.subr.bf16.mxu0 %v2625_v1  ;;  %2322 = vmatprep.subr.bf16.mxu1 %v2625_v1 }
  0x2c   : > { %2316 = vmatprep.mubr.msk.bf16.mxu0 %vm2626_vm0, %v2625_v1  ;;  %2324 = vmatprep.mubr.msk.bf16.mxu1 %vm2626_vm0, %v2625_v1 }
  0x2e   : > { %2315 = vmatpush3.bf16.msra.mxu0 %v2519_v13  ;;  %2323 = vmatpush3.bf16.msra.mxu1 %v2520_v14 }
  0x2f   : > { %2328 = vmatprep.subr.bf16.mxu0 %v2625_v1  ;;  %2336 = vmatprep.subr.bf16.mxu1 %v2625_v1 }
  0x31   : > { %2317 = vmatmul.mubr.msk.bf16.vlgmr.msra.gmra.mrb[8].mxu0 %vm583_vm1, %v2783_v8  ;;  %2325 = vmatmul.mubr.msk.bf16.vlgmr.msra.gmra.mrb[8].mxu1 %vm583_vm1, %v2783_v8 }
  0x32   : > { %2329 = vmatpush3.bf16.msra.mxu0 %v2521_v15  ;;  %2337 = vmatpush3.bf16.msra.mxu1 %v2522_v16 }
  0x33   : > { %2330 = vmatprep.subr.bf16.mxu0 %v2625_v1  ;;  %2338 = vmatprep.subr.bf16.mxu1 %v2625_v1 }
  0x34   : > { %2332 = vmatprep.mubr.msk.bf16.mxu0 %vm2626_vm0, %v2625_v1  ;;  %2340 = vmatprep.mubr.msk.bf16.mxu1 %vm2626_vm0, %v2625_v1 }
  0x36   : > { %2331 = vmatpush3.bf16.msra.mxu0 %v2523_v17  ;;  %2339 = vmatpush3.bf16.msra.mxu1 %v2524_v18  ;;  %v2135_v17 = vld [vmem:[%s3152_s2 + $0x2] ss:$0 sm:$0xff]  ;;  %v2136_v18 = vld [vmem:[%s3152_s2 + $0x3] ss:$0 sm:$0xff] }
  0x37   : > { %2344 = vmatprep.subr.bf16.mxu0 %v2625_v1  ;;  %2352 = vmatprep.subr.bf16.mxu1 %v2625_v1 }
  0x39   : > { %2333 = vmatmul.mubr.msk.bf16.vlgmr.msra.gmra.mrb[12].mxu0 %vm583_vm1, %v2783_v8  ;;  %2341 = vmatmul.mubr.msk.bf16.vlgmr.msra.gmra.mrb[12].mxu1 %vm583_vm1, %v2783_v8 }
  0x3a   : > { %2345 = vmatpush3.bf16.msra.mxu0 %v2525_v19  ;;  %2348 = vmatprep.mubr.msk.bf16.mxu0 %vm2626_vm0, %v2625_v1 }
  0x3b   : > { %2346 = vmatprep.subr.bf16.mxu0 %v2625_v1  ;;  %2356 = vmatprep.mubr.msk.bf16.mxu1 %vm2626_vm0, %v2625_v1 }
  0x3c   : > { %2353 = vmatpush3.bf16.msra.mxu1 %v2526_v20 }
  0x3d   : > { %2354 = vmatprep.subr.bf16.mxu1 %v2625_v1 }
  0x3e   : > { %2347 = vmatpush3.bf16.msra.mxu0 %v2527_v21 }
  0x3f   : > { %2360 = vmatprep.subr.bf16.mxu0 %v2625_v1 }
  0x40   : > { %2355 = vmatpush3.bf16.msra.mxu1 %v2528_v22 }
  0x41   : > { %2349 = vmatmul.mubr.msk.bf16.vlgmr.msra.gmra.mrb[16].mxu0 %vm583_vm1, %v2783_v8  ;;  %2368 = vmatprep.subr.bf16.mxu1 %v2625_v1 }
  0x42   : > { %2364 = vmatprep.mubr.msk.bf16.mxu0 %vm2626_vm0, %v2625_v1  ;;  %2361 = vmatpush3.bf16.msra.mxu0 %v2529_v23 }
  0x43   : > { %2357 = vmatmul.mubr.msk.bf16.vlgmr.msra.gmra.mrb[16].mxu1 %vm583_vm1, %v2783_v8  ;;  %2362 = vmatprep.subr.bf16.mxu0 %v2625_v1 }
  0x44   : > { %2369 = vmatpush3.bf16.msra.mxu1 %v2530_v24  ;;  %2372 = vmatprep.mubr.msk.bf16.mxu1 %vm2626_vm0, %v2625_v1 }
  0x45   : > { %2370 = vmatprep.subr.bf16.mxu1 %v2625_v1 }
  0x46   : > { %2363 = vmatpush3.bf16.msra.mxu0 %v2531_v25  ;;  %v2141_v25 = vld [vmem:[%s3152_s2 + $0x8] ss:$0 sm:$0xff] }
  0x47   : > { %2376 = vmatprep.subr.bf16.mxu0 %v2625_v1 }
  0x48   : > { %2371 = vmatpush3.bf16.msra.mxu1 %v2532_v26 }
  0x49   : > { %2382 = vmatprep.subr.bf16.mxu1 %v2625_v1  ;;  %2365 = vmatmul.mubr.msk.bf16.vlgmr.msra.gmra.mrb[20].mxu0 %vm583_vm1, %v2783_v8 }
  0x4a   : > { %2378 = vmatprep.mubr.msk.bf16.mxu0 %vm2626_vm0, %v2625_v1 }
  0x4b   : > { %2373 = vmatmul.mubr.msk.bf16.vlgmr.msra.gmra.mrb[20].mxu1 %vm583_vm1, %v2783_v8 }
  0x4c   : > { %2384 = vmatprep.mubr.msk.bf16.mxu1 %vm2626_vm0, %v2625_v1 }
  0xf4   : > { %v621_v27 = vpop.f32.mrb[0].mxu0  ;;  %v673_v28 = vpop.f32.mrb[0].mxu1 }
  0xf5   : > { %v2286_v29 = vpop.f32.mrb[1].mxu0  ;;  %v2294_v30 = vpop.f32.mrb[1].mxu1  ;;  %v622_v63 = vadd.f32 %v2133_v57, %v621_v27  ;;  %v674_v0 = vadd.f32 %v2134_v58, %v673_v28  ;;  %v2142_v27 = vld [vmem:[%s3152_s2 + $0x9] ss:$0 sm:$0xff] }
  0xf6   : > { %v624_v31 = vpop.f32.mrb[2].mxu0  ;;  %v676_v32 = vpop.f32.mrb[2].mxu1 }
  0xf7   : > { %v2287_v33 = vpop.f32.mrb[3].mxu0  ;;  %v2295_v34 = vpop.f32.mrb[3].mxu1  ;;  %v1199_v11 = vpack.c.bf16 %v622_v63, %v622_v63  ;;  %v1200_v12 = vpack.c.bf16 %v674_v0, %v674_v0 }
  0xfc   : > { %v725_v35 = vpop.f32.mrb[4].mxu0  ;;  %v777_v36 = vpop.f32.mrb[4].mxu1 }
  0xfd   : > { %v2302_v37 = vpop.f32.mrb[5].mxu0  ;;  %v2310_v38 = vpop.f32.mrb[5].mxu1  ;;  %v726_v21 = vadd.f32 %v2135_v17, %v725_v35  ;;  %v778_v22 = vadd.f32 %v2136_v18, %v777_v36 }
  0xfe   : > { %v728_v39 = vpop.f32.mrb[6].mxu0  ;;  %v780_v40 = vpop.f32.mrb[6].mxu1 }
  0xff   : > { %v2303_v41 = vpop.f32.mrb[7].mxu0  ;;  %v2311_v42 = vpop.f32.mrb[7].mxu1  ;;  %v1201_v23 = vpack.c.bf16 %v726_v21, %v726_v21  ;;  %v1202_v24 = vpack.c.bf16 %v778_v22, %v778_v22 }
 0x104   : > { %v829_v45 = vpop.f32.mrb[8].mxu0  ;;  %v881_v46 = vpop.f32.mrb[8].mxu1 }
 0x105   : > { %v830_v47 = vadd.f32 %v2137_v43, %v829_v45  ;;  %v882_v48 = vadd.f32 %v2138_v44, %v881_v46  ;;  %v2318_v49 = vpop.f32.mrb[9].mxu0  ;;  %v2326_v50 = vpop.f32.mrb[9].mxu1 }
 0x106   : > { %v832_v51 = vpop.f32.mrb[10].mxu0  ;;  %v884_v52 = vpop.f32.mrb[10].mxu1 }
 0x107   : > { %v1203_v53 = vpack.c.bf16 %v830_v47, %v830_v47  ;;  %v1204_v54 = vpack.c.bf16 %v882_v48, %v882_v48  ;;  %v2319_v55 = vpop.f32.mrb[11].mxu0  ;;  %v2327_v56 = vpop.f32.mrb[11].mxu1 }
 0x109   : > { %v1216_v59 = vsel %vm1211_vm2, %v1203_v53, 0  ;;  %v1262_v60 = vsel %vm1211_vm2, %v1204_v54, 0 }
 0x10a   : > { %2377 = vmatpush3.bf16.xpose.msra.mxu0 %v1216_v59  ;;  %2383 = vmatpush3.bf16.xpose.msra.mxu1 %v1262_v60 }
 0x10b   : > { %2388 = vmatprep.subr.bf16.mxu0 %v2625_v1  ;;  %2394 = vmatprep.subr.bf16.mxu1 %v2625_v1 }
 0x10c   : > { %v933_v2 = vpop.f32.mrb[12].mxu0  ;;  %v985_v3 = vpop.f32.mrb[12].mxu1 }
 0x10d   : > { %v934_v4 = vadd.f32 %v2139_v61, %v933_v2  ;;  %v986_v5 = vadd.f32 %v2140_v62, %v985_v3  ;;  %v2334_v6 = vpop.f32.mrb[13].mxu0  ;;  %v2342_v8 = vpop.f32.mrb[13].mxu1 }
 0x10e   : > { %v936_v9 = vpop.f32.mrb[14].mxu0  ;;  %v988_v10 = vpop.f32.mrb[14].mxu1 }
 0x10f   : > { %v1205_v13 = vpack.c.bf16 %v934_v4, %v934_v4  ;;  %v1206_v14 = vpack.c.bf16 %v986_v5, %v986_v5  ;;  %v2335_v15 = vpop.f32.mrb[15].mxu0  ;;  %v2343_v16 = vpop.f32.mrb[15].mxu1 }
 0x111   : > { %v1308_v19 = vsel %vm1211_vm2, %v1205_v13, 0  ;;  %v1354_v20 = vsel %vm1211_vm2, %v1206_v14, 0  ;;  %2379 = vmatmul.mubr.msk.bf16.vlgmr.msra.gmra.mrb[24].mxu0 %vm1211_vm2, %v1199_v11  ;;  %2385 = vmatmul.mubr.msk.bf16.vlgmr.msra.gmra.mrb[24].mxu1 %vm1211_vm2, %v1200_v12 }
 0x112   : > { %2389 = vmatpush3.bf16.xpose.msra.mxu0 %v1308_v19  ;;  %2395 = vmatpush3.bf16.xpose.msra.mxu1 %v1354_v20 }
 0x113   : > { %2390 = vmatprep.mubr.msk.bf16.mxu0 %vm2626_vm0, %v2625_v1  ;;  %2396 = vmatprep.mubr.msk.bf16.mxu1 %vm2626_vm0, %v2625_v1 }
 0x114   : > { %2400 = vmatprep.subr.bf16.mxu0 %v2625_v1  ;;  %2406 = vmatprep.subr.bf16.mxu1 %v2625_v1  ;;  %v1037_v26 = vpop.f32.mrb[16].mxu0 }
 0x115   : > { %v1038_v28 = vadd.f32 %v2141_v25, %v1037_v26  ;;  %v2350_v29 = vpop.f32.mrb[17].mxu0 }
 0x116   : > { %v1040_v30 = vpop.f32.mrb[18].mxu0  ;;  %v1089_v31 = vpop.f32.mrb[16].mxu1  ;;  %v2143_v29 = vld [vmem:[%s3152_s2 + $0xa] ss:$0 sm:$0xff] }
 0x117   : > { %v1207_v32 = vpack.c.bf16 %v1038_v28, %v1038_v28  ;;  %v2351_v33 = vpop.f32.mrb[19].mxu0  ;;  %v1090_v34 = vadd.f32 %v2142_v27, %v1089_v31  ;;  %v2358_v35 = vpop.f32.mrb[17].mxu1 }
 0x118   : > { %v1092_v36 = vpop.f32.mrb[18].mxu1 }
 0x119   : > { %2391 = vmatmul.mubr.msk.bf16.vlgmr.msra.gmra.mrb[28].mxu0 %vm1211_vm2, %v1201_v23  ;;  %2397 = vmatmul.mubr.msk.bf16.vlgmr.msra.gmra.mrb[28].mxu1 %vm1211_vm2, %v1202_v24  ;;  %v1449_v37 = vsel %vm1447_vm3, %v1207_v32, 0  ;;  %v1208_v38 = vpack.c.bf16 %v1090_v34, %v1090_v34  ;;  %v2359_v39 = vpop.f32.mrb[19].mxu1  ;;  %v2144_v32 = vld [vmem:[%s3152_s2 + $0xb] ss:$0 sm:$0xff]  ;;  %s3087_s2 = scalar_lea.hbm %s3143_s13, %s2209_s30 }
 0x11a   : > { %2402 = vmatprep.mubr.msk.bf16.mxu0 %vm2626_vm0, %v2625_v1  ;;  %2408 = vmatprep.mubr.msk.bf16.mxu1 %vm2626_vm0, %v2625_v1 }
 0x11b   : > { %2401 = vmatpush3.bf16.msra.mxu0 %v1449_v37  ;;  %v1495_v40 = vsel %vm1447_vm3, %v1208_v38, 0 }
 0x11c   : > { %2412 = vmatprep.subr.bf16.mxu0 %v2625_v1  ;;  %2407 = vmatpush3.bf16.msra.mxu1 %v1495_v40  ;;  %v2961_v41 = vpop.f32.mrb[20].mxu0 }
 0x11d   : > { %2418 = vmatprep.subr.bf16.mxu1 %v2625_v1  ;;  %v2366_v43 = vpop.f32.mrb[21].mxu0  ;;  %v1142_v30 = vadd.f32 %v2143_v29, %v2961_v41 }
 0x11e   : > { %v2963_v42 = vpop.f32.mrb[20].mxu1  ;;  %v1144_v45 = vpop.f32.mrb[22].mxu0 }
 0x11f   : > { %v2374_v44 = vpop.f32.mrb[21].mxu1  ;;  %v2367_v47 = vpop.f32.mrb[23].mxu0  ;;  %v1209_v34 = vpack.c.bf16 %v1142_v30, %v1142_v30  ;;  %v1194_v35 = vadd.f32 %v2144_v32, %v2963_v42  ;;  %v1633_v42 = vld [vmem:[%s3133_s3] sm:$0xf] }
 0x120   : > { %v1196_v46 = vpop.f32.mrb[22].mxu1 }
 0x121   : > { %v2375_v48 = vpop.f32.mrb[23].mxu1  ;;  %v1541_v40 = vsel %vm1447_vm3, %v1209_v34, 0  ;;  %v1210_v43 = vpack.c.bf16 %v1194_v35, %v1194_v35 }
 0x123   : > { %v1587_v46 = vsel %vm1447_vm3, %v1210_v43, 0 }
 0x1e4   : > { %v1252_v49 = vpop.f32.mrb[24].mxu0  ;;  %v1298_v50 = vpop.f32.mrb[24].mxu1 }
 0x1e5   : > { %v2380_v51 = vpop.f32.mrb[25].mxu0  ;;  %v2386_v52 = vpop.f32.mrb[25].mxu1  ;;  %v1396_v53 = vsel %vm1211_vm2, %v1252_v49, -inf  ;;  %v1399_v58 = vsel %vm1211_vm2, %v1298_v50, -inf }
 0x1e6   : > { %v1301_v54 = vpop.f32.mrb[26].mxu1  ;;  %1397 = vmax.xlane.f32.xlu0 %v1396_v53  ;;  %v1255_v55 = vpop.f32.mrb[26].mxu0  ;;  %v1634_v53 = vld [vmem:[%s3133_s3 + $0x4] sm:$0xf] }
 0x1e7   : > { %v2381_v56 = vpop.f32.mrb[27].mxu0  ;;  %v2387_v57 = vpop.f32.mrb[27].mxu1  ;;  %v1687_v54 = vsel %vm1447_vm3, %v1634_v53, 0  ;;  %v1635_v55 = vld [vmem:[%s3133_s3 + $0x8] sm:$0xf] }
 0x1ea   : > { %1400 = vmax.xlane.f32.xlu0 %v1399_v58 }
 0x1ec   : > { %v1344_v59 = vpop.f32.mrb[28].mxu0  ;;  %v1390_v60 = vpop.f32.mrb[28].mxu1 }
 0x1ed   : > { %v2392_v61 = vpop.f32.mrb[29].mxu0  ;;  %v2398_v62 = vpop.f32.mrb[29].mxu1  ;;  %v1402_v63 = vsel %vm1211_vm2, %v1344_v59, -inf  ;;  %v1405_v5 = vsel %vm1211_vm2, %v1390_v60, -inf }
 0x1ee   : > { %v1393_v0 = vpop.f32.mrb[30].mxu1  ;;  %1403 = vmax.xlane.f32.xlu1 %v1402_v63  ;;  %v1347_v2 = vpop.f32.mrb[30].mxu0  ;;  %v1636_v61 = vld [vmem:[%s3133_s3 + $0xc] sm:$0xf] }
 0x1ef   : > { %v2393_v3 = vpop.f32.mrb[31].mxu0  ;;  %v2399_v4 = vpop.f32.mrb[31].mxu1 }
 0x1f0   : > { %v1779_v3 = vsel %vm1447_vm3, %v1636_v61, 0  ;;  %v2536_v61 = vld [vmem:[%s3139_s9 + $0x8] sm:$0xff]  }
 0x1f2   : > { %1406 = vmax.xlane.f32.xlu1 %v1405_v5 }
 0x273   : > { %v1398_v6 = vpop.xlane.xlu0 %1397 }
 0x274   : > { %v1408_v8 = vsub.f32 %v1252_v49, %v1398_v6  ;;  %v1641_v49 = vsel %vm1447_vm3, %v1633_v42, 0 }
 0x276   : > { %v1412_v9 = vmul.f32 1.442695, %v1408_v8 }
 0x277   : > { %v1401_v10 = vpop.xlane.xlu0 %1400 }
 0x278   : > { %2539 = vpow2.f32 %v1412_v9  ;;  %v1409_v11 = vsub.f32 %v1298_v50, %v1401_v10 }
 0x27a   : > { %v1414_v12 = vmul.f32 1.442695, %v1409_v11 }
 0x27b   : > { %v1404_v13 = vpop.xlane.xlu1 %1403 }
 0x27c   : > { %2541 = vpow2.f32 %v1414_v12  ;;  %v1410_v14 = vsub.f32 %v1344_v59, %v1404_v13  ;;  %v1733_v59 = vsel %vm1447_vm3, %v1635_v55, 0 }
 0x27e   : > { %v1416_v15 = vmul.f32 1.442695, %v1410_v14 }
 0x27f   : > { %v1407_v16 = vpop.xlane.xlu1 %1406 }
 0x280   : > { %2543 = vpow2.f32 %v1416_v15  ;;  %v1411_v17 = vsub.f32 %v1390_v60, %v1407_v16 }
 0x282   : > { %v2540_v18 = vpop.eup %2539  ;;  %v1418_v19 = vmul.f32 1.442695, %v1411_v17 }
 0x283   : > { %v1420_v20 = vsel %vm1211_vm2, %v2540_v18, 0.0 }
 0x284   : > { %2545 = vpow2.f32 %v1418_v19  ;;  %1421 = vadd.xlane.f32.xlu0 %v1420_v20 }
 0x286   : > { %v2542_v21 = vpop.eup %2541 }
 0x287   : > { %v1423_v22 = vsel %vm1211_vm2, %v2542_v21, 0.0 }
 0x288   : > { %1424 = vadd.xlane.f32.xlu1 %v1423_v22 }
 0x28a   : > { %v2544_v23 = vpop.eup %2543 }
 0x28b   : > { %v1426_v24 = vsel %vm1211_vm2, %v2544_v23, 0.0 }
 0x28c   : > { %1427 = vadd.xlane.f32.xlu0 %v1426_v24 }
 0x28e   : > { %v2546_v25 = vpop.eup %2545 }
 0x28f   : > { %v1429_v26 = vsel %vm1211_vm2, %v2546_v25, 0.0 }
 0x290   : > { %1430 = vadd.xlane.f32.xlu1 %v1429_v26 }
 0x311   : > { %v1422_v27 = vpop.xlane.xlu0 %1421 }
 0x312   : > { %2547 = vrcp.f32 %v1422_v27 }
 0x315   : > { %v1425_v28 = vpop.xlane.xlu1 %1424 }
 0x316   : > { %2549 = vrcp.f32 %v1425_v28 }
 0x319   : > { %v1428_v31 = vpop.xlane.xlu0 %1427 }
 0x31a   : > { %2551 = vrcp.f32 %v1428_v31 }
 0x31c   : > { %v2548_v33 = vpop.eup %2547 }
 0x31d   : > { %v1436_v36 = vmul.f32 %v2548_v33, %v2540_v18  ;;  %v1431_v37 = vpop.xlane.xlu1 %1430 }
 0x31e   : > { %2553 = vrcp.f32 %v1431_v37 }
 0x31f   : > { %v1440_v38 = vpack.c.bf16 %v1436_v36, %v1436_v36  ;;  %v2193_v36 = vld [vmem:[%s3134_s4] ss:$0 sm:$0xff] }
 0x320   : > { %v2550_v39 = vpop.eup %2549 }
 0x321   : > { %v1437_v44 = vmul.f32 %v2550_v39, %v2542_v21  ;;  %2403 = vmatmul.mubr.msk.bf16.vlgmr.msra.gmra.mrb[32].mxu0 %vm1211_vm2, %v1440_v38 }
 0x322   : > { %2413 = vmatpush3.bf16.msra.mxu0 %v1541_v40  ;;  %2414 = vmatprep.mubr.msk.bf16.mxu0 %vm2626_vm0, %v2625_v1 }
 0x323   : > { %v1441_v41 = vpack.c.bf16 %v1437_v44, %v1437_v44  ;;  %2424 = vmatprep.subr.bf16.mxu0 %v2625_v1 }
 0x324   : > { %v2552_v45 = vpop.eup %2551 }
 0x325   : > { %v1438_v47 = vmul.f32 %v2552_v45, %v2544_v23  ;;  %2409 = vmatmul.mubr.msk.bf16.vlgmr.msra.gmra.mrb[32].mxu1 %vm1211_vm2, %v1441_v41 }
 0x326   : > { %2419 = vmatpush3.bf16.msra.mxu1 %v1587_v46  ;;  %2420 = vmatprep.mubr.msk.bf16.mxu1 %vm2626_vm0, %v2625_v1 }
 0x327   : > { %v1442_v48 = vpack.c.bf16 %v1438_v47, %v1438_v47  ;;  %2430 = vmatprep.subr.bf16.mxu1 %v2625_v1 }
 0x328   : > { %v2554_v50 = vpop.eup %2553 }
 0x329   : > { %v1439_v51 = vmul.f32 %v2554_v50, %v2546_v25  ;;  %2415 = vmatmul.mubr.msk.bf16.vlgmr.msra.gmra.mrb[36].mxu0 %vm1211_vm2, %v1442_v48  ;;  %v2534_v50 = vld [vmem:[%s3137_s7 + $0x8] sm:$0xff]  }
 0x32a   : > { %2425 = vmatpush3.bf16.msra.mxu0 %v1641_v49  ;;  %2426 = vmatprep.mubr.msk.bf16.mxu0 %vm2626_vm0, %v2625_v1  ;;  %v2533_v49 = vld [vmem:[%s3137_s7] sm:$0xff]  }
 0x32b   : > { %v1443_v52 = vpack.c.bf16 %v1439_v51, %v1439_v51  ;;  %2436 = vmatprep.subr.bf16.mxu0 %v2625_v1 }
 0x32d   : > { %2421 = vmatmul.mubr.msk.bf16.vlgmr.msra.gmra.mrb[36].mxu1 %vm1211_vm2, %v1443_v52 }
 0x32e   : > { %2432 = vmatprep.mubr.msk.bf16.mxu1 %vm2626_vm0, %v2625_v1  ;;  %2431 = vmatpush3.bf16.msra.mxu1 %v1687_v54  ;;  %v2194_v54 = vld [vmem:[%s3135_s5] ss:$0 sm:$0xff] }
 0x32f   : > { %2442 = vmatprep.subr.bf16.mxu1 %v2625_v1 }
 0x3f4   : > { %v1485_v56 = vpop.f32.mrb[32].mxu0 }
 0x3f5   : > { %v1629_v57 = vpack.c.bf16 %v1485_v56, %v1485_v56  ;;  %v2404_v58 = vpop.f32.mrb[33].mxu0  ;;  %v2195_v56 = vld [vmem:[%s3136_s6] ss:$0 sm:$0xff] }
 0x3f6   : > { %v1488_v60 = vpop.f32.mrb[34].mxu0 }
 0x3f7   : > { %v2405_v62 = vpop.f32.mrb[35].mxu0  ;;  %2427 = vmatmul.mubr.msk.bf16.vlgmr.msra.gmra.mrb[40].mxu0 %vm1211_vm2, %v1629_v57  ;;  %v2535_v60 = vld [vmem:[%s3139_s9] sm:$0xff]  }
 0x3f8   : > { %v1531_v63 = vpop.f32.mrb[32].mxu1  ;;  %2437 = vmatpush3.bf16.msra.mxu0 %v1733_v59  ;;  %2438 = vmatprep.mubr.msk.bf16.mxu0 %vm2626_vm0, %v2625_v1  ;;  %v2537_v62 = vld [vmem:[%s3139_s9 + $0x10] sm:$0xff]  }
 0x3f9   : > { %v1630_v0 = vpack.c.bf16 %v1531_v63, %v1531_v63  ;;  %v2410_v2 = vpop.f32.mrb[33].mxu1  ;;  %2448 = vmatprep.subr.bf16.mxu0 %v2625_v1  ;;  %v2538_v63 = vld [vmem:[%s3139_s9 + $0x18] sm:$0xff]  }
 0x3fa   : > { %v1534_v4 = vpop.f32.mrb[34].mxu1 }
 0x3fb   : > { %v2411_v5 = vpop.f32.mrb[35].mxu1  ;;  %2433 = vmatmul.mubr.msk.bf16.vlgmr.msra.gmra.mrb[40].mxu1 %vm1211_vm2, %v1630_v0  ;;  %v2196_v0 = vld [vmem:[%s3138_s8] ss:$0 sm:$0xff] }
 0x3fc   : > { %v1577_v6 = vpop.f32.mrb[36].mxu0  ;;  %2443 = vmatpush3.bf16.msra.mxu1 %v1779_v3  ;;  %2444 = vmatprep.mubr.msk.bf16.mxu1 %vm2626_vm0, %v2625_v1 }
 0x3fd   : > { %v1631_v8 = vpack.c.bf16 %v1577_v6, %v1577_v6  ;;  %v2416_v9 = vpop.f32.mrb[37].mxu0  ;;  %2456 = vmatprep.subr.bf16.mxu1 %v2625_v1 }
 0x3fe   : > { %v1580_v10 = vpop.f32.mrb[38].mxu0 }
 0x3ff   : > { %v2417_v11 = vpop.f32.mrb[39].mxu0  ;;  %2439 = vmatmul.mubr.msk.bf16.vlgmr.msra.gmra.mrb[44].mxu0 %vm1211_vm2, %v1631_v8 }
 0x400   : > { %v1623_v12 = vpop.f32.mrb[36].mxu1  ;;  %2452 = vmatprep.mubr.msk.bf16.mxu0 %vm2626_vm0, %v2625_v1  ;;  %2449 = vmatpush3.bf16.msra.mxu0 %v2533_v49 }
 0x401   : > { %v1632_v13 = vpack.c.bf16 %v1623_v12, %v1623_v12  ;;  %v2422_v14 = vpop.f32.mrb[37].mxu1  ;;  %2450 = vmatprep.subr.bf16.mxu0 %v2625_v1 }
 0x402   : > { %v1626_v15 = vpop.f32.mrb[38].mxu1 }
 0x403   : > { %v2423_v16 = vpop.f32.mrb[39].mxu1  ;;  %2445 = vmatmul.mubr.msk.bf16.vlgmr.msra.gmra.mrb[44].mxu1 %vm1211_vm2, %v1632_v13  ;;  %v2200_v13 = vld [vmem:[%s3140_s10] ss:$0 sm:$0xff] }
 0x404   : > { %2464 = vmatprep.mubr.msk.bf16.mxu1 %vm2626_vm0, %v2625_v1  ;;  %2451 = vmatpush3.bf16.msra.mxu0 %v2534_v50 }
 0x405   : > { %2457 = vmatpush3.bf16.msra.mxu1 %v2535_v60 }
 0x406   : > { %2458 = vmatprep.subr.bf16.mxu1 %v2625_v1 }
 0x409   : > { %2459 = vmatpush3.bf16.msra.mxu1 %v2536_v61 }
 0x40a   : > { %2460 = vmatprep.subr.bf16.mxu1 %v2625_v1 }
 0x40d   : > { %2461 = vmatpush3.bf16.msra.mxu1 %v2537_v62 }
 0x40e   : > { %2462 = vmatprep.subr.bf16.mxu1 %v2625_v1 }
 0x411   : > { %2463 = vmatpush3.bf16.msra.mxu1 %v2538_v63 }
 0x4ca   : > { %v1677_v17 = vpop.f32.mrb[40].mxu0 }
 0x4cb   : > { %v2428_v18 = vpop.f32.mrb[41].mxu0  ;;  %v1821_v22 = vsel %vm583_vm1, %v1677_v17, 0.0 }
 0x4cc   : > { %v1680_v19 = vpop.f32.mrb[42].mxu0 }
 0x4cd   : > { %v2429_v20 = vpop.f32.mrb[43].mxu0 }
 0x4ce   : > { %v1723_v21 = vpop.f32.mrb[40].mxu1 }
 0x4cf   : > { %v1822_v23 = vsel %vm583_vm1, %v1723_v21, 0.0  ;;  %v2434_v24 = vpop.f32.mrb[41].mxu1 }
 0x4d0   : > { %v1823_v25 = vadd.f32 %v1822_v23, %v1821_v22  ;;  %v1726_v26 = vpop.f32.mrb[42].mxu1 }
 0x4d1   : > { %v2435_v27 = vpop.f32.mrb[43].mxu1 }
 0x4d2   : > { %v1769_v28 = vpop.f32.mrb[44].mxu0 }
 0x4d3   : > { %v1824_v29 = vsel %vm583_vm1, %v1769_v28, 0.0  ;;  %v2440_v30 = vpop.f32.mrb[45].mxu0 }
 0x4d4   : > { %v1825_v31 = vadd.f32 %v1824_v29, %v1823_v25  ;;  %v1772_v32 = vpop.f32.mrb[46].mxu0  ;;  %v2206_v30 = vld [vmem:[%s3141_s11] ss:$0 sm:$0xff] }
 0x4d5   : > { %v2441_v33 = vpop.f32.mrb[47].mxu0  ;;  %v2207_v32 = vld [vmem:[%s3142_s12] ss:$0 sm:$0xff] }
 0x4d6   : > { %v1815_v34 = vpop.f32.mrb[44].mxu1 }
 0x4d7   : > { %v1826_v35 = vsel %vm583_vm1, %v1815_v34, 0.0  ;;  %v2446_v37 = vpop.f32.mrb[45].mxu1 }
 0x4d8   : > { %v1827_v38 = vadd.f32 %v1826_v35, %v1825_v31  ;;  %v1818_v39 = vpop.f32.mrb[46].mxu1 }
 0x4d9   : > { %v2447_v40 = vpop.f32.mrb[47].mxu1 }
 0x4da   : > { %v1835_v43 = vadd.f32 %v2193_v36, %v1827_v38 }
 0x4dc   : > { %v1836_v44 = vadd.f32 %v1835_v43, %v2778_v7 }
 0x4de   : > { %v1839_v41 = vsel %vm583_vm1, %v1836_v44, 0.0 }
 0x4df   : > { %1840 = vadd.xlane.f32.xlu0 %v1839_v41 }
 0x56c   : > { %v1841_v45 = vpop.xlane.xlu0 %1840 }
 0x56d   : > { %v1843_v42 = vmul.f32 0.03125, %v1841_v45 }
 0x56f   : > { %v1844_v46 = vsub.f32 %v1836_v44, %v1843_v42 }
 0x571   : > { %v1845_v47 = vmul.f32 %v1844_v46, %v1844_v46 }
 0x573   : > { %v1846_v48 = vsel %vm583_vm1, %v1845_v47, 0.0 }
 0x574   : > { %1847 = vadd.xlane.f32.xlu1 %v1846_v48 }
 0x601   : > { %v1848_v7 = vpop.xlane.xlu1 %1847 }
 0x602   : > { %v1849_v51 = vmul.f32 0.03125, %v1848_v7 }
 0x604   : > { %v1850_v52 = vadd.f32 1e-05, %v1849_v51 }
 0x606   : > { %2555 = vrsqrt.f32 %v1850_v52 }
 0x610   : > { %v2556_v53 = vpop.eup %2555 }
 0x611   : > { %v1852_v55 = vmul.f32 %v2556_v53, %v1844_v46 }
 0x613   : > { %v1859_v57 = vmul.f32 %v2194_v54, %v1852_v55 }
 0x615   : > { %v1866_v58 = vadd.f32 %v2195_v56, %v1859_v57 }
 0x617   : > { %v1867_v59 = vpack.c.bf16 %v1866_v58, %v1866_v58 }
 0x619   : > { %2453 = vmatmul.mubr.msk.bf16.vlgmr.msra.gmra.mrb[48].mxu0 %vm583_vm1, %v1867_v59 }
 0x6ec   : > { %v1928_v2 = vpop.f32.mrb[48].mxu0 }
 0x6ed   : > { %v1929_v3 = vadd.f32 %v2196_v0, %v1928_v2  ;;  %v2454_v4 = vpop.f32.mrb[49].mxu0 }
 0x6ee   : > { %v1931_v5 = vpop.f32.mrb[50].mxu0 }
 0x6ef   : > { %v1935_v6 = vmul.f32 0.70710677, %v1929_v3  ;;  %v2455_v8 = vpop.f32.mrb[51].mxu0  ;;  %v1934_v10 = vmul.f32 0.5, %v1929_v3 }
 0x6f1   : > { %2557 = verf.f32 %v1935_v6 }
 0x6fb   : > { %v2558_v9 = vpop.eup %2557 }
 0x6fc   : > { %v1937_v11 = vadd.f32 1.0, %v2558_v9 }
 0x6fe   : > { %v1938_v1 = vmul.f32 %v1937_v11, %v1934_v10 }
 0x700   : > { %v1939_v12 = vpack.c.bf16 %v1938_v1, %v1938_v1 }
 0x702   : > { %2465 = vmatmul.mubr.msk.bf16.vlgmr.msra.gmra.mrb[48].mxu1 %vm1979_vm4, %v1939_v12 }
 0x7d5   : > { %v2017_v14 = vpop.f32.mrb[48].mxu1 }
 0x7d6   : > { %v2018_v15 = vadd.f32 %v2200_v13, %v2017_v14  ;;  %v2466_v16 = vpop.f32.mrb[49].mxu1 }
 0x7d7   : > { %v2020_v17 = vpop.f32.mrb[50].mxu1 }
 0x7d8   : > { %v2467_v18 = vpop.f32.mrb[51].mxu1  ;;  %v2023_v19 = vadd.f32 %v2018_v15, %v1866_v58 }
 0x7da   : > { %v2026_v20 = vsel %vm583_vm1, %v2023_v19, 0.0 }
 0x7db   : > { %2027 = vadd.xlane.f32.xlu0 %v2026_v20 }
 0x868   : > { %v2028_v21 = vpop.xlane.xlu0 %2027 }
 0x869   : > { %v2029_v22 = vmul.f32 0.03125, %v2028_v21 }
 0x86b   : > { %v2030_v23 = vsub.f32 %v2023_v19, %v2029_v22 }
 0x86d   : > { %v2031_v24 = vmul.f32 %v2030_v23, %v2030_v23 }
 0x86f   : > { %v2032_v25 = vsel %vm583_vm1, %v2031_v24, 0.0 }
 0x870   : > { %2033 = vadd.xlane.f32.xlu1 %v2032_v25 }
 0x8fd   : > { %v2034_v26 = vpop.xlane.xlu1 %2033 }
 0x8fe   : > { %v2035_v27 = vmul.f32 0.03125, %v2034_v26 }
 0x900   : > { %v2036_v28 = vadd.f32 1e-05, %v2035_v27 }
 0x902   : > { %2559 = vrsqrt.f32 %v2036_v28 }
 0x90c   : > { %v2560_v29 = vpop.eup %2559 }
 0x90d   : > { %v2038_v31 = vmul.f32 %v2560_v29, %v2030_v23 }
 0x90f   : > { %v2045_v33 = vmul.f32 %v2206_v30, %v2038_v31 }
 0x911   : > { %v2052_v34 = vadd.f32 %v2207_v32, %v2045_v33 }
 0x913   : > { %2053 = vst.msk [vmem:[%s431_s15] sm:$0xff] %vm583_vm1, %v2052_v34 }
 0x914   : > { %2574 = shalt.err (!%p2571_p3)
}
 0x915   : > { %s2575_s0 = scalar_lea.hbm %s3087_s2, 128  ;;  %s2579_s24 = scalar_lea.hbm %s3143_s13, 256 }
 0x916   : > { %p2576_p4 = scmp.ne.s32.totalorder %s3087_s2, %s2575_s0  ;;  %p2580_p9 = scmp.lt.u32.totalorder %s3087_s2, %s3143_s13 }
 0x917   : > { %p2581_p10 = scmp.lt.u32.totalorder %s2579_s24, %s2575_s0  ;;  %p2583_p12 = scmp.lt.u32.totalorder %s2575_s0, %s3087_s2 }
 0x918   : > { %p2577_p7 = pnand %p2576_p4, %p2736_p5 }
 0x919   : > { %p2582_p11 = por %p2581_p10, %p2580_p9 }
 0x91a   : > { %p2578_p8 = pneg %p2577_p7 }
 0x91b   : > { %p2584_p13 = por %p2583_p12, %p2582_p11 }
 0x91d   : > { %p2585_p0 = pnand %p2584_p13, %p2578_p8 }
 0x91f   : > { %2588 = shalt.err (!%p2585_p0)
}
 0x920   : > { %2468 = dma.vmem_to_hbm [thread:$0]  (%p2736_p5), %s3089_s16, 128, %s3087_s2, %s2055_s17  }
 0x921 PF: > { %p2474_p1 = scmp.ge.s32.totalorder %s2623_s28, 2  ;;  %s2080_s22 = sand.u32 1, %s2611_s25  }
 0x922   : > { %s2081_s29 = scalar_lea.sflag [#allocation3], %s2080_s22 }
 0x923   : > { %p2471_p2 = pnand %p2474_p1, %p2740_p6 }
 0x925   : > { %2606 = dma.done.wait (!%p2471_p2), %s2081_s29, 128  }
 0x926   : > { %2608 = vsyncadd (!%p2471_p2), %s2081_s29, 4294967168  ;;  %s3153_s21 = sld [smem:[#allocation5_spill]]  ;;  %p23_p3 = scmp.ge.s32.totalorder %s2723_s14, 4  }
 0x927   : > { %s3154_s25 = smov %s2615_s26  ;;  %s3155_s26 = smov %s2619_s27 }
 0x928   : > { %s3157_s28 = smov %s2723_s14  ;;  %25 = sbr.rel (!%p23_p3) target bundleno = 7 (0x7), region = 107 }
 0x92c   : > { %s3156_s27 = smov %s3153_s21 }
 0x92f   :  { %2086 = vsyncpa [#allocation3], 1 }
 0x930   :  { %2088 = vsyncpa [#allocation3 + $0x1], 1 }

</bundles_post_ra>
